<compile_context>
chip_gen: v6e
topology: v6e:2x2x1
jax: 0.10.0
libtpu: 0.0.40
codegen_flags: <defaults>
</compile_context>

<pallas_src>
from typing import NamedTuple

import numpy as np
import jax
import jax.numpy as jnp
from jax.experimental import pallas as pl
from jax.experimental.pallas import tpu as pltpu

LANE = 128
SUBLANE = 8


def _round_up(n, m):
    return ((n + m - 1) // m) * m


def _cdiv(a, b):
    return -(-a // b)


class PolicyParams(NamedTuple):
    """Packed, padded parameters (built once, reused every forward call)."""
    w: jax.Array          # [L, k_pad, k_pad] bf16, zero-padded weights
    b: jax.Array          # [L, 1, k_pad]     f32,  zero-padded biases
    dims: tuple           # (in_dim, hidden..., out_dim)
    k_pad: int


def pack_policy_params(weights, biases):
    """One-time host-side packing of all layers into two lane-dense buffers.

    weights[i]: [in_i, out_i], biases[i]: [1, out_i].
    Weight i occupies rows [0, in_i) x lanes [0, out_i) of w[i]; everything
    else is zero, so padded lanes stay exactly 0 through matmul/ReLU.
    """
    num_linear = len(weights)
    assert len(biases) == num_linear
    dims = [weights[0].shape[0]] + [w.shape[1] for w in weights]
    k_pad = _round_up(max(dims), LANE)

    w_buf = np.zeros((num_linear, k_pad, k_pad), np.float32)
    b_buf = np.zeros((num_linear, 1, k_pad), np.float32)
    for i, (w, b) in enumerate(zip(weights, biases)):
        fan_in, fan_out = w.shape
        w_buf[i, :fan_in, :fan_out] = np.asarray(w, dtype=np.float32)
        b_buf[i, 0, :fan_out] = np.asarray(b, dtype=np.float32).reshape(-1)

    return PolicyParams(
        w=jnp.asarray(w_buf, jnp.bfloat16),   # MXU-native operand dtype
        b=jnp.asarray(b_buf, jnp.float32),    # bias add stays f32
        dims=tuple(int(d) for d in dims),
        k_pad=k_pad,
    )


def _make_policy_kernel(num_linear: int, in_dim: int, out_dim: int):
    """Kernel refs: x [tb, in_dim] f32, w [L, k_pad, k_pad] bf16,
    b [L, 1, k_pad] f32, out [tb, k_pad] f32."""

    def kernel(x_ref, w_ref, b_ref, o_ref):
        # Layer 0: contract the native-width input against the first in_dim
        # rows of the padded bf16 weight (bf16 MXU path, f32 accumulation).
        h = jnp.dot(x_ref[...].astype(jnp.bfloat16), w_ref[0, :in_dim, :],
                    preferred_element_type=jnp.float32) + b_ref[0]
        for i in range(1, num_linear):
            # nn.Dropout(p=0) is the identity in eval mode.
            # TODO(synk): train-mode dropout (p>0) would need pltpu PRNG masking.
            h = jnp.maximum(h, 0.0)                                    # ReLU, f32
            h = jnp.dot(h.astype(jnp.bfloat16), w_ref[i],
                        preferred_element_type=jnp.float32) + b_ref[i]

        # Masked, numerically stable softmax over the first `out_dim` lanes (f32).
        lane_ids = jax.lax.broadcasted_iota(jnp.int32, h.shape, 1)
        h = jnp.where(lane_ids < out_dim, h, -jnp.inf)
        m = jnp.max(h, axis=-1, keepdims=True)
        e = jnp.exp(h - m)                                 # masked lanes -> 0
        denom = jnp.sum(e, axis=-1, keepdims=True)
        o_ref[...] = (e / denom).astype(o_ref.dtype)       # exact normalization

    return kernel


def _choose_batch_tiling(batch, max_tile, small_threshold=256):
    """Return (tile_rows, padded_batch)."""
    if batch <= small_threshold:
        # Tiny batch: one full-array block, no padding (full-dim blocks are legal).
        return batch, batch
    # >= 2 steps so the "parallel" grid can use both v7x TensorCores; tile
    # chosen so batch padding waste is < 8 rows.
    n_steps = max(2, _cdiv(batch, max_tile))
    tb = _round_up(_cdiv(batch, n_steps), SUBLANE)
    return tb, tb * n_steps


def policy_forward(x, params: PolicyParams, *, max_batch_tile=2048):
    """Policy forward pass (single Pallas kernel).

    x      : [batch, in_dim] float32
    params : PolicyParams from pack_policy_params (reused across calls)
    returns: [batch, out_dim] float32, rows sum to 1
    """
    batch, in_dim = x.shape
    assert in_dim == params.dims[0]
    out_dim = params.dims[-1]
    k_pad = params.k_pad
    num_linear = len(params.dims) - 1
    num_layers_p = params.w.shape[0]

    tb, pad_batch = _choose_batch_tiling(batch, max_batch_tile)
    x_in = x.astype(jnp.float32)
    if pad_batch != batch:
        # Row-only padding at native feature width (no 128-lane inflation).
        x_in = jnp.pad(x_in, ((0, pad_batch - batch), (0, 0)))

    flops = 2 * pad_batch * sum(a * b for a, b in zip(params.dims[:-1], params.dims[1:]))
    cost = pl.CostEstimate(
        flops=flops,
        transcendentals=pad_batch * k_pad,
        bytes_accessed=(4 * x_in.size + 2 * params.w.size + 4 * params.b.size
                        + 4 * pad_batch * k_pad),
    )

    out_padded = pl.pallas_call(
        _make_policy_kernel(num_linear, in_dim, out_dim),
        out_shape=jax.ShapeDtypeStruct((pad_batch, k_pad), jnp.float32),
        grid=(pad_batch // tb,),
        in_specs=[
            # Input keeps its native feature width; only the batch dim is tiled.
            pl.BlockSpec((tb, in_dim), lambda i: (i, 0)),
            # Constant block index: packed params are DMA'd once and stay
            # VMEM-resident across all batch-grid steps; single-buffered.
            pl.BlockSpec((num_layers_p, k_pad, k_pad), lambda i: (0, 0, 0),
                         pipeline_mode=pl.Buffered(1)),
            pl.BlockSpec((num_layers_p, 1, k_pad), lambda i: (0, 0, 0),
                         pipeline_mode=pl.Buffered(1)),
        ],
        out_specs=pl.BlockSpec((tb, k_pad), lambda i: (i, 0)),  # lane-dense output
        compiler_params=pltpu.CompilerParams(
            dimension_semantics=("parallel",),
        ),
        cost_estimate=cost,
    )(x_in, params.w, params.b)

    return out_padded[:batch, :out_dim]


def init_policy_params(key, layers, with_bias=True):
    """Deterministic init mimicking nn.Linear default (U[-1/sqrt(in), 1/sqrt(in)])."""
    weights, biases = [], []
    for i in range(len(layers) - 1):
        fan_in, fan_out = layers[i], layers[i + 1]
        key, kw, kb = jax.random.split(key, 3)
        bound = 1.0 / jnp.sqrt(jnp.float32(fan_in))
        w = jax.random.uniform(kw, (fan_in, fan_out), jnp.float32,
                               minval=-bound, maxval=bound)
        if with_bias:
            b = jax.random.uniform(kb, (1, fan_out), jnp.float32,
                                   minval=-bound, maxval=bound)
        else:
            b = jnp.zeros((1, fan_out), jnp.float32)
        weights.append(w)
        biases.append(b)
    return weights, biases


def _reference_forward(x, weights, biases):
    """Pure-JAX f32 reference for verification."""
    h = x
    n = len(weights)
    for i, (w, b) in enumerate(zip(weights, biases)):
        h = h @ w + b
        if i < n - 1:
            h = jnp.maximum(h, 0.0)
    return jax.nn.softmax(h, axis=-1)


if __name__ == "__main__":
    # Policy(layers=(32, 64, 64, 8), with_bias=True, dropout=0), eval mode.
    layers = (32, 64, 64, 8)
    batch = 4

    key = jax.random.PRNGKey(0)
    key, kx, kp = jax.random.split(key, 3)

    x = jax.random.normal(kx, (batch, layers[0]), jnp.float32)
    weights, biases = init_policy_params(kp, layers, with_bias=True)

    # One-time packing (cached / reused for every forward call below).
    params = pack_policy_params(weights, biases)

    out = jax.block_until_ready(policy_forward(x, params))
    ref = _reference_forward(x, weights, biases)
    assert out.shape == (batch, layers[-1])
    # Exact divide in the softmax -> rows sum to 1 at f32 precision.
    assert jnp.allclose(jnp.sum(out, axis=-1), 1.0, atol=1e-4)
    # bf16 matmul operands (f32 accumulate) vs f32 reference -> ~1e-2 tolerance.
    assert jnp.allclose(out, ref, atol=2e-2, rtol=2e-2)

    # Also exercise the multi-step path: batch=600 -> tb=304, pad_batch=608,
    # grid of 2 "parallel" steps (both v7x TCs), <1.4% batch-padding waste.
    batch2 = 600
    key, kx2 = jax.random.split(key)
    x2 = jax.random.normal(kx2, (batch2, layers[0]), jnp.float32)
    out2 = jax.block_until_ready(policy_forward(x2, params))
    ref2 = _reference_forward(x2, weights, biases)
    assert out2.shape == (batch2, layers[-1])
    assert jnp.allclose(jnp.sum(out2, axis=-1), 1.0, atol=1e-4)
    assert jnp.allclose(out2, ref2, atol=2e-2, rtol=2e-2)

    print("KERNEL_OK")
</pallas_src>

<mosaic_0001>
module attributes {stable_mosaic.version = 11 : i64} {
  func.func @kernel(%arg0: i32, %arg1: memref<4x32xf32, #tpu.memory_space<vmem>>, %arg2: memref<3x128x128xbf16, #tpu.memory_space<vmem>>, %arg3: memref<3x1x128xf32, #tpu.memory_space<vmem>>, %arg4: memref<4x128xf32, #tpu.memory_space<vmem>>) attributes {dimension_semantics = [#tpu.dimension_semantics<parallel>], iteration_bounds = array<i64: 1>, scalar_prefetch = 0 : i64, scratch_operands = 0 : i64, tpu.core_type = #tpu.core_type<tc>, window_params = [{transform_indices = @transform_0, window_bounds = array<i64: 4, 32>}, {pipeline_mode = #tpu.pipeline_mode<synchronous>, transform_indices = @transform_1, window_bounds = array<i64: 3, 128, 128>}, {pipeline_mode = #tpu.pipeline_mode<synchronous>, transform_indices = @transform_2, window_bounds = array<i64: 3, 1, 128>}, {transform_indices = @transform_3, window_bounds = array<i64: 4, 128>}]} {
    %c0 = arith.constant 0 : index
    %c0_0 = arith.constant 0 : index
    %0 = vector.load %arg1[%c0, %c0_0] : memref<4x32xf32, #tpu.memory_space<vmem>>, vector<4x32xf32>
    %1 = arith.truncf %0 : vector<4x32xf32> to vector<4x32xbf16>
    %c0_1 = arith.constant 0 : index
    %c0_2 = arith.constant 0 : index
    %c0_3 = arith.constant 0 : index
    %2 = vector.load %arg2[%c0_1, %c0_2, %c0_3] : memref<3x128x128xbf16, #tpu.memory_space<vmem>>, vector<1x32x128xbf16>
    %3 = vector.shape_cast %2 : vector<1x32x128xbf16> to vector<32x128xbf16>
    %cst = arith.constant dense<0.000000e+00> : vector<4x128xf32>
    %4 = tpu.matmul %1, %3, %cst {dimension_numbers = #tpu.dot_dimension_numbers<[1], [0], [0], [1], [0, 0, 1, 1], [], []>} : vector<4x32xbf16>, vector<32x128xbf16>, vector<4x128xf32> -> vector<4x128xf32>
    %c0_4 = arith.constant 0 : index
    %c0_5 = arith.constant 0 : index
    %c0_6 = arith.constant 0 : index
    %5 = vector.load %arg3[%c0_4, %c0_5, %c0_6] : memref<3x1x128xf32, #tpu.memory_space<vmem>>, vector<1x1x128xf32>
    %6 = vector.shape_cast %5 : vector<1x1x128xf32> to vector<1x128xf32>
    %7 = vector.broadcast %6 : vector<1x128xf32> to vector<4x128xf32>
    %8 = arith.addf %4, %7 : vector<4x128xf32>
    %cst_7 = arith.constant 0.000000e+00 : f32
    %9 = vector.broadcast %cst_7 : f32 to vector<4x128xf32>
    %10 = arith.maximumf %8, %9 : vector<4x128xf32>
    %11 = arith.truncf %10 : vector<4x128xf32> to vector<4x128xbf16>
    %c1 = arith.constant 1 : index
    %c0_8 = arith.constant 0 : index
    %c0_9 = arith.constant 0 : index
    %12 = vector.load %arg2[%c1, %c0_8, %c0_9] : memref<3x128x128xbf16, #tpu.memory_space<vmem>>, vector<1x128x128xbf16>
    %13 = vector.shape_cast %12 : vector<1x128x128xbf16> to vector<128x128xbf16>
    %cst_10 = arith.constant dense<0.000000e+00> : vector<4x128xf32>
    %14 = tpu.matmul %11, %13, %cst_10 {dimension_numbers = #tpu.dot_dimension_numbers<[1], [0], [0], [1], [0, 0, 1, 1], [], []>} : vector<4x128xbf16>, vector<128x128xbf16>, vector<4x128xf32> -> vector<4x128xf32>
    %c1_11 = arith.constant 1 : index
    %c0_12 = arith.constant 0 : index
    %c0_13 = arith.constant 0 : index
    %15 = vector.load %arg3[%c1_11, %c0_12, %c0_13] : memref<3x1x128xf32, #tpu.memory_space<vmem>>, vector<1x1x128xf32>
    %16 = vector.shape_cast %15 : vector<1x1x128xf32> to vector<1x128xf32>
    %17 = vector.broadcast %16 : vector<1x128xf32> to vector<4x128xf32>
    %18 = arith.addf %14, %17 : vector<4x128xf32>
    %cst_14 = arith.constant 0.000000e+00 : f32
    %19 = vector.broadcast %cst_14 : f32 to vector<4x128xf32>
    %20 = arith.maximumf %18, %19 : vector<4x128xf32>
    %21 = arith.truncf %20 : vector<4x128xf32> to vector<4x128xbf16>
    %c2 = arith.constant 2 : index
    %c0_15 = arith.constant 0 : index
    %c0_16 = arith.constant 0 : index
    %22 = vector.load %arg2[%c2, %c0_15, %c0_16] : memref<3x128x128xbf16, #tpu.memory_space<vmem>>, vector<1x128x128xbf16>
    %23 = vector.shape_cast %22 : vector<1x128x128xbf16> to vector<128x128xbf16>
    %cst_17 = arith.constant dense<0.000000e+00> : vector<4x128xf32>
    %24 = tpu.matmul %21, %23, %cst_17 {dimension_numbers = #tpu.dot_dimension_numbers<[1], [0], [0], [1], [0, 0, 1, 1], [], []>} : vector<4x128xbf16>, vector<128x128xbf16>, vector<4x128xf32> -> vector<4x128xf32>
    %c2_18 = arith.constant 2 : index
    %c0_19 = arith.constant 0 : index
    %c0_20 = arith.constant 0 : index
    %25 = vector.load %arg3[%c2_18, %c0_19, %c0_20] : memref<3x1x128xf32, #tpu.memory_space<vmem>>, vector<1x1x128xf32>
    %26 = vector.shape_cast %25 : vector<1x1x128xf32> to vector<1x128xf32>
    %27 = vector.broadcast %26 : vector<1x128xf32> to vector<4x128xf32>
    %28 = arith.addf %24, %27 : vector<4x128xf32>
    %29 = tpu.iota {dimensions = array<i32: 1>} : vector<4x128xi32>
    %c8_i32 = arith.constant 8 : i32
    %30 = vector.broadcast %c8_i32 : i32 to vector<4x128xi32>
    %31 = arith.cmpi slt, %29, %30 : vector<4x128xi32>
    %cst_21 = arith.constant 0xFF800000 : f32
    %32 = vector.broadcast %cst_21 : f32 to vector<4x128xf32>
    %33 = arith.select %31, %28, %32 : vector<4x128xi1>, vector<4x128xf32>
    %cst_22 = arith.constant dense<0xFF800000> : vector<4xf32>
    %34 = vector.multi_reduction <maximumf>, %33, %cst_22 [1] : vector<4x128xf32> to vector<4xf32>
    %35 = vector.shape_cast %34 : vector<4xf32> to vector<4x1xf32>
    %36 = vector.broadcast %35 : vector<4x1xf32> to vector<4x128xf32>
    %37 = arith.subf %33, %36 : vector<4x128xf32>
    %38 = math.exp %37 : vector<4x128xf32>
    %cst_23 = arith.constant dense<0.000000e+00> : vector<4xf32>
    %39 = vector.multi_reduction <add>, %38, %cst_23 [1] : vector<4x128xf32> to vector<4xf32>
    %40 = vector.shape_cast %39 : vector<4xf32> to vector<4x1xf32>
    %41 = vector.broadcast %40 : vector<4x1xf32> to vector<4x128xf32>
    %42 = arith.divf %38, %41 : vector<4x128xf32>
    %c0_24 = arith.constant 0 : index
    %c0_25 = arith.constant 0 : index
    %43 = vector.load %arg4[%c0_24, %c0_25] : memref<4x128xf32, #tpu.memory_space<vmem>>, vector<4x128xf32>
    tpu.vector_store %arg4[%c0_24, %c0_25], %42 {strides = array<i32>} : memref<4x128xf32, #tpu.memory_space<vmem>>, vector<4x128xf32>,
    return
  }
  func.func @transform_0(%arg0: i32) -> (i32, i32) {
    %c0_i32 = arith.constant 0 : i32
    %c0_i32_0 = arith.constant 0 : i32
    return %arg0, %c0_i32 : i32, i32
  }
  func.func @transform_1(%arg0: i32) -> (i32, i32, i32) {
    %c0_i32 = arith.constant 0 : i32
    %c0_i32_0 = arith.constant 0 : i32
    %c0_i32_1 = arith.constant 0 : i32
    %c0_i32_2 = arith.constant 0 : i32
    return %c0_i32, %c0_i32_0, %c0_i32_1 : i32, i32, i32
  }
  func.func @transform_2(%arg0: i32) -> (i32, i32, i32) {
    %c0_i32 = arith.constant 0 : i32
    %c0_i32_0 = arith.constant 0 : i32
    %c0_i32_1 = arith.constant 0 : i32
    %c0_i32_2 = arith.constant 0 : i32
    return %c0_i32, %c0_i32_0, %c0_i32_1 : i32, i32, i32
  }
  func.func @transform_3(%arg0: i32) -> (i32, i32) {
    %c0_i32 = arith.constant 0 : i32
    %c0_i32_0 = arith.constant 0 : i32
    return %arg0, %c0_i32 : i32, i32
  }
}

</mosaic_0001>

<bundles_post_ra>
// kernel: tpu_custom_call.1
= control target key start
LH: loop header
LB: loop body
LE: loop exit
PB: predicated region body
PF: predicated region fallthrough
CT: control target
= control target key end

     0   :  { %8 = vsyncpa [#allocation3], 0  ;;  %s631_s0 = inlined_call_operand.hbm [shape: f32[4,32], index: 0, kind: input, shape index: {}]   ;;  %s632_s1 = inlined_call_operand.hbm [shape: bf16[3,128,128], index: 1, kind: input, shape index: {}]   ;;  %s633_s2 = inlined_call_operand.vmem [shape: f32[3,1,128], index: 2, kind: input, shape index: {}]   ;;  %s634_s3 = inlined_call_operand.hbm [shape: f32[4,128], index: 3, kind: output, shape index: {}]  }
   0x1   :  { %9 = vsyncpa [#allocation6], 0 }
   0x2   :  { %10 = vsyncpa [#allocation4], 0  ;;  %s562_s12 = smov [#allocation2]   ;;  %s563_s14 = smov [#allocation5]  }
   0x3   :  { %s17_s13 = sshll.u32 %s562_s12, 4  ;;  %s26_s15 = sshll.u32 %s563_s14, 4  ;;  %s18_s13 = int_to_ptr.vmem [resolvable:$true] %s17_s13  ;;  %s27_s15 = int_to_ptr.vmem [resolvable:$true] %s26_s15 }
   0x4   :  { %s504_s16 = scalar_lea.vmem %s18_s13, 64  ;;  %p509_p1 = scmp.lt.s32.totalorder %s18_s13, %s18_s13 }
   0x5   :  { %p505_p0 = scmp.ne.s32.totalorder %s18_s13, %s504_s16  ;;  %p510_p2 = scmp.lt.s32.totalorder %s504_s16, %s504_s16 }
   0x7   :  { %p511_p3 = por %p510_p2, %p509_p1 }
   0x9   :  { %p512_p4 = pnand %p511_p3, %p505_p0 }
   0xb   :  { %515 = shalt.err (!%p512_p4)
}
   0xc   :  { %20 = dma.hbm_to_vmem [thread:$0]  %s631_s0, 64, %s18_s13, [#allocation3]  }
   0xd   :  { %s524_s19 = scalar_lea.vmem %s27_s15, 3072  ;;  %p529_p6 = scmp.lt.s32.totalorder %s27_s15, %s27_s15 }
   0xe   :  { %p525_p5 = scmp.ne.s32.totalorder %s27_s15, %s524_s19  ;;  %p530_p7 = scmp.lt.s32.totalorder %s524_s19, %s524_s19 }
  0x10   :  { %p531_p8 = por %p530_p7, %p529_p6 }
  0x12   :  { %p532_p9 = pnand %p531_p8, %p525_p5 }
  0x14   :  { %535 = shalt.err (!%p532_p9)
}
  0x15   :  { %s564_s20 = smov 64   ;;  %s565_s21 = smov 4  }
  0x16   :  { %32 = dma.hbm_to_vmem [thread:$0]  %s632_s1, 3072, %s27_s15, [#allocation6], %s564_s20, %s564_s20, %s565_s21  }
  0x17   :  { %556 = dma.done.wait [#allocation3], 64  }
  0x18   :  { %557 = vsyncadd [#allocation3], 4294967232 }
  0x19   :  { %558 = dma.done.wait [#allocation6], 3072  }
  0x1a   :  { %559 = vsyncadd [#allocation6], 4294964224  ;;  %v566_v0 = vmov 0.0   ;;  %vm567_vm0 = vmmov 0   ;;  %v474_v1 = vld [vmem:[#allocation5 + $0x8] sm:$0xff]   ;;  %v475_v2 = vld [vmem:[#allocation5] sm:$0xff]   ;;  %v341_v37 = vlaneseq }
  0x1b   :  { %419 = vmatprep.subr.bf16.mxu0 %v566_v0  ;;  %423 = vmatprep.mubr.msk.bf16.mxu0 %vm567_vm0, %v566_v0  ;;  %v42_v3 = vld [vmem:[#allocation2] sm:$0xf]  ;;  %v477_v6 = vld [vmem:[#allocation5 + $0x70] sm:$0xff]   ;;  %vm67_vm1 = vcmask 261120   ;;  %v478_v7 = vld [vmem:[#allocation5 + $0x68] sm:$0xff]   ;;  %vm345_vm3 = vcmask 1043456  }
  0x1c   :  { %427 = vmatprep.subr.bf16.mxu1 %v566_v0  ;;  %443 = vmatprep.mubr.msk.bf16.mxu1 %vm567_vm0, %v566_v0  ;;  %v476_v4 = vld [vmem:[#allocation5 + $0x78] sm:$0xff]   ;;  %v43_v5 = vpack.c.bf16 %v42_v3, %v42_v3  ;;  %v479_v8 = vld [vmem:[#allocation5 + $0x60] sm:$0xff]   ;;  %v481_v10 = vld [vmem:[#allocation5 + $0x50] sm:$0xff]   ;;  %v342_v38 = vand.u32 127, %v341_v37 }
  0x1d   :  { %420 = vmatpush3.bf16.msra.mxu0 %v474_v1  ;;  %428 = vmatpush3.bf16.msra.mxu1 %v476_v4  ;;  %v480_v9 = vld [vmem:[#allocation5 + $0x58] sm:$0xff]   ;;  %v482_v11 = vld [vmem:[#allocation5 + $0x48] sm:$0xff]   ;;  %v483_v12 = vld [vmem:[#allocation5 + $0x40] sm:$0xff]  }
  0x1e   :  { %421 = vmatprep.subr.bf16.mxu0 %v566_v0  ;;  %429 = vmatprep.subr.bf16.mxu1 %v566_v0  ;;  %v484_v13 = vld [vmem:[#allocation5 + $0xb8] sm:$0xff]   ;;  %v485_v14 = vld [vmem:[#allocation5 + $0xb0] sm:$0xff]   ;;  %v486_v15 = vld [vmem:[#allocation5 + $0xa8] sm:$0xff]   ;;  %vm343_vm2 = vcmp.lt.s32.totalorder %v342_v38, 8 }
  0x1f   :  { %v487_v16 = vld [vmem:[#allocation5 + $0xa0] sm:$0xff]   ;;  %v488_v17 = vld [vmem:[#allocation5 + $0x98] sm:$0xff]   ;;  %v489_v18 = vld [vmem:[#allocation5 + $0x90] sm:$0xff]  }
  0x20   :  { %v374_v19 = vld [vmem:[%s633_s2] ss:$0 sm:$0xff]  ;;  %v490_v27 = vld [vmem:[#allocation5 + $0x88] sm:$0xff]   ;;  %v491_v28 = vld [vmem:[#allocation5 + $0x80] sm:$0xff]  }
  0x21   :  { %422 = vmatpush3.bf16.msra.mxu0 %v475_v2  ;;  %430 = vmatpush3.bf16.msra.mxu1 %v477_v6  ;;  %v379_v29 = vld [vmem:[%s633_s2 + $0x1] ss:$0 sm:$0xff]  ;;  %v389_v39 = vld [vmem:[%s633_s2 + $0x2] ss:$0 sm:$0xff]  ;;  %s568_s2 = smov [#allocation7]  }
  0x22   :  { %447 = vmatprep.subr.bf16.mxu0 %v566_v0  ;;  %431 = vmatprep.subr.bf16.mxu1 %v566_v0  ;;  %s364_s28 = sshll.u32 %s568_s2, 4  ;;  %s365_s28 = int_to_ptr.vmem [resolvable:$true] %s364_s28 }
  0x23   :  { %s536_s29 = scalar_lea.vmem %s365_s28, 64  ;;  %p541_p11 = scmp.lt.s32.totalorder %s365_s28, %s365_s28 }
  0x24   :  { %424 = vmatmul.mubr.msk.bf16.vlgmr.msra.gmra.mxu0 %vm67_vm1, %v43_v5  ;;  %p537_p10 = scmp.ne.s32.totalorder %s365_s28, %s536_s29  ;;  %p542_p12 = scmp.lt.s32.totalorder %s536_s29, %s536_s29 }
  0x25   :  { %463 = vmatprep.mubr.msk.bf16.mxu0 %vm567_vm0, %v566_v0  ;;  %432 = vmatpush3.bf16.msra.mxu1 %v478_v7 }
  0x26   :  { %433 = vmatprep.subr.bf16.mxu1 %v566_v0  ;;  %448 = vmatpush3.bf16.msra.mxu0 %v484_v13  ;;  %p543_p13 = por %p542_p12, %p541_p11 }
  0x27   :  { %449 = vmatprep.subr.bf16.mxu0 %v566_v0 }
  0x28   :  { %p544_p0 = pnand %p543_p13, %p537_p10 }
  0x29   :  { %434 = vmatpush3.bf16.msra.mxu1 %v479_v8 }
  0x2a   :  { %435 = vmatprep.subr.bf16.mxu1 %v566_v0  ;;  %450 = vmatpush3.bf16.msra.mxu0 %v485_v14 }
  0x2b   :  { %451 = vmatprep.subr.bf16.mxu0 %v566_v0 }
  0x2d   :  { %436 = vmatpush3.bf16.msra.mxu1 %v480_v9 }
  0x2e   :  { %437 = vmatprep.subr.bf16.mxu1 %v566_v0  ;;  %452 = vmatpush3.bf16.msra.mxu0 %v486_v15 }
  0x2f   :  { %453 = vmatprep.subr.bf16.mxu0 %v566_v0 }
  0x31   :  { %438 = vmatpush3.bf16.msra.mxu1 %v481_v10 }
  0x32   :  { %439 = vmatprep.subr.bf16.mxu1 %v566_v0  ;;  %454 = vmatpush3.bf16.msra.mxu0 %v487_v16 }
  0x33   :  { %455 = vmatprep.subr.bf16.mxu0 %v566_v0 }
  0x35   :  { %440 = vmatpush3.bf16.msra.mxu1 %v482_v11 }
  0x36   :  { %441 = vmatprep.subr.bf16.mxu1 %v566_v0  ;;  %456 = vmatpush3.bf16.msra.mxu0 %v488_v17 }
  0x37   :  { %457 = vmatprep.subr.bf16.mxu0 %v566_v0 }
  0x39   :  { %442 = vmatpush3.bf16.msra.mxu1 %v483_v12 }
  0x3a   :  { %458 = vmatpush3.bf16.msra.mxu0 %v489_v18 }
  0x3b   :  { %459 = vmatprep.subr.bf16.mxu0 %v566_v0 }
  0x3e   :  { %460 = vmatpush3.bf16.msra.mxu0 %v490_v27 }
  0x3f   :  { %461 = vmatprep.subr.bf16.mxu0 %v566_v0 }
  0x42   :  { %462 = vmatpush3.bf16.msra.mxu0 %v491_v28 }
  0xe4   :  { %v105_v20 = vpop.f32.mrf.mxu0 }
  0xe5   :  { %v106_v21 = vadd.f32 %v374_v19, %v105_v20 }
  0xe6   :  { %v425_v22 = vpop.f32.mrf.mxu0 }
  0xe7   :  { %v111_v23 = vmax.f32 %v106_v21, 0.0 }
  0xe8   :  { %v108_v24 = vpop.f32.mrf.mxu0 }
  0xe9   :  { %v112_v25 = vpack.c.bf16 %v111_v23, %v111_v23 }
  0xea   :  { %v426_v26 = vpop.f32.mrf.mxu0 }
  0xeb   :  { %444 = vmatmul.mubr.bf16.vlgmr.msra.gmra.mxu1 %v112_v25 }
 0x1ab   :  { %v220_v30 = vpop.f32.mrf.mxu1 }
 0x1ac   :  { %v221_v31 = vadd.f32 %v379_v29, %v220_v30 }
 0x1ad   :  { %v445_v32 = vpop.f32.mrf.mxu1 }
 0x1ae   :  { %v226_v33 = vmax.f32 %v221_v31, 0.0 }
 0x1af   :  { %v223_v34 = vpop.f32.mrf.mxu1 }
 0x1b0   :  { %v227_v35 = vpack.c.bf16 %v226_v33, %v226_v33 }
 0x1b1   :  { %v446_v36 = vpop.f32.mrf.mxu1 }
 0x1b2   :  { %464 = vmatmul.mubr.bf16.vlgmr.msra.gmra.mxu0 %v227_v35 }
 0x272   :  { %v335_v40 = vpop.f32.mrf.mxu0 }
 0x273   :  { %v336_v41 = vadd.f32 %v389_v39, %v335_v40 }
 0x274   :  { %v465_v42 = vpop.f32.mrf.mxu0 }
 0x275   :  { %v344_v43 = vsel %vm343_vm2, %v336_v41, -inf }
 0x276   :  { %v338_v44 = vpop.f32.mrf.mxu0  ;;  %v346_v45 = vsel %vm345_vm3, %v344_v43, -inf }
 0x277   :  { %347 = vmax.xlane.f32.xlu0 %v346_v45 }
 0x278   :  { %v466_v46 = vpop.f32.mrf.mxu0 }
 0x300   :  { %v348_v47 = vpop.xlane.xlu0 %347 }
 0x301   :  { %v349_v48 = vsub.f32 %v344_v43, %v348_v47 }
 0x303   :  { %v350_v49 = vmul.f32 1.442695, %v349_v48 }
 0x305   :  { %492 = vpow2.f32 %v350_v49 }
 0x312   :  { %v493_v50 = vpop.eup %492 }
 0x313   :  { %v352_v51 = vsel %vm345_vm3, %v493_v50, 0.0 }
 0x314   :  { %353 = vadd.xlane.f32.xlu0 %v352_v51 }
 0x39d   :  { %v354_v52 = vpop.xlane.xlu0 %353 }
 0x39e   :  { %494 = vrcp.f32 %v354_v52 }
 0x3ab   :  { %v495_v53 = vpop.eup %494 }
 0x3ac   :  { %v356_v54 = vmul.f32 %v495_v53, %v493_v50 }
 0x3ae   :  { %357 = vst [vmem:[#allocation7] sm:$0xf] %v356_v54 }
 0x3af   :  { %547 = shalt.err (!%p544_p0)
}
 0x3b0   :  { %367 = dma.vmem_to_hbm [thread:$0]  %s365_s28, 64, %s634_s3, [#allocation4]  }
 0x3b1   :  { %560 = dma.done.wait [#allocation4], 64  }
 0x3b2   :  { %561 = vsyncadd [#allocation4], 4294967232 }
 0x3b3   :  { %371 = vsyncpa [#allocation3], 1 }
 0x3b4   :  { %372 = vsyncpa [#allocation6], 1 }
 0x3b5   :  { %373 = vsyncpa [#allocation4], 1 }

</bundles_post_ra>
